<compile_context>
chip_gen: v5e
topology: v5e:2x2
jax: 0.10.0
libtpu: 0.0.40
codegen_flags: <defaults>
</compile_context>

<pallas_src>
from functools import partial

import jax
import jax.numpy as jnp
from jax import lax
from jax.experimental import pallas as pl
from jax.experimental.pallas import tpu as pltpu


def _global_attention_kernel(q_ref, v_ref, w1_ref, b1_ref, w2_ref, b2_ref, o_ref):
    # q_ref: (T, Bb, Q)  v_ref: (S, Bb, V)  o_ref: (T, Bb, O) -- the module's own
    # seq-first / batch-middle layout, so no transposes are needed anywhere.
    T, Bb, Q = q_ref.shape
    S, _, V = v_ref.shape
    O = o_ref.shape[-1]

    w1 = w1_ref[...]          # (V, Q)      used as  x @ w1^T  (contract dim 1)
    b1 = b1_ref[...]          # (1, V)
    w2 = w2_ref[...]          # (O, V + Q)  used as  feed @ w2^T (contract dim 1)
    b2 = b2_ref[...]          # (1, O)

    q3 = q_ref[...]           # (T, Bb, Q)
    v3 = v_ref[...]           # (S, Bb, V)

    outs = []
    # Static per-batch loop.  At these sizes every matmul is MXU-starved no
    # matter how it is batched (M=T=8, K,N<=64), so the per-batch structure is
    # not the bottleneck; the grid/batch_block knob handles large-B scaling.
    for b in range(Bb):
        q_b = q3[:, b, :]     # (T, Q)
        v_b = v3[:, b, :]     # (S, V)

        # linear1: query_resize = q @ W1^T + b1
        qr = lax.dot_general(q_b, w1, (((1,), (1,)), ((), ())),
                             preferred_element_type=jnp.float32) + b1          # (T, V)

        # attn_scores = qr @ v^T  (contract over V directly; no materialized v.T)
        scores = lax.dot_general(qr, v_b, (((1,), (1,)), ((), ())),
                                 preferred_element_type=jnp.float32)           # (T, S)

        # numerically-stable softmax over S (exact divide, parity with torch.softmax)
        m = jnp.max(scores, axis=-1, keepdims=True)
        e = jnp.exp(scores - m)
        attn = e / jnp.sum(e, axis=-1, keepdims=True)                          # (T, S)

        # attended_values = attn @ v
        attended = lax.dot_general(attn, v_b, (((1,), (0,)), ((), ())),
                                   preferred_element_type=jnp.float32)         # (T, V)

        # linear2(concat([attended, query])) as ONE fused matmul against W2^T
        feed = jnp.concatenate([attended, q_b.astype(jnp.float32)], axis=-1)   # (T, V+Q)
        out_b = jnp.tanh(
            lax.dot_general(feed, w2, (((1,), (1,)), ((), ())),
                            preferred_element_type=jnp.float32) + b2)          # (T, O)
        outs.append(out_b.astype(o_ref.dtype))

    # Single full-tile store in the module's native (T, Bb, O) layout.
    o_ref[...] = jnp.stack(outs, axis=1)

    # TODO(synk): the PyTorch module also stashes `self.alphas = attn.detach()` as
    # module state; that side-effect has no kernel-output equivalent here (add
    # `attn` as a second output if any caller needs it).


@partial(jax.jit, static_argnames=("batch_block",))
def global_attention(query, values, w1, b1, w2, b2, *, batch_block=None):
    """query: (T, B, Q); values: (S, B, V); w1: (V, Q); b1: (V,);
       w2: (O, V+Q) (torch concat order: columns [:V] -> attended, [V:] -> query);
       b2: (O,).   Returns (T, B, O).

       batch_block: batch elements per grid step.  Default is size-aware: one
       step for small B (v5e/v6e single-TC), ~8/2 parallel steps for large B so
       both v7x TensorCores are fed and input/output DMAs pipeline.  A custom
       value must equal B, or divide B and be a multiple of 8 (sublane tiling of
       the batch dim)."""
    T, B, Q = query.shape
    S, _, V = values.shape
    O, F = w2.shape
    assert F == V + Q and w1.shape == (V, Q)

    if batch_block is None:
        if B % 64 == 0:
            Bb = B // 8            # 8 parallel grid steps, Bb % 8 == 0
        elif B % 16 == 0:
            Bb = B // 2            # 2 parallel grid steps, Bb % 8 == 0
        else:
            Bb = B                 # small / odd batch: one big step (toy sizes)
    else:
        Bb = batch_block
        if Bb != B:
            assert B % Bb == 0 and Bb % 8 == 0, (
                "batch_block must equal B, or divide B and be a multiple of 8")
    grid = (B // Bb,)

    # Only wrapper-side ops: rank-expanding reshapes of the biases (same buffer
    # layout, no HBM copy).  Activations and weights are passed through as-is.
    b1_2d = b1.reshape(1, V)
    b2_2d = b2.reshape(1, O)

    flops = 2 * B * T * (Q * V + 2 * S * V + (V + Q) * O)
    transcendentals = B * T * (S + O)          # exp + tanh
    bytes_accessed = 4 * (T * B * Q + S * B * V + T * B * O
                          + V * Q + V + O * (V + Q) + O)

    return pl.pallas_call(
        _global_attention_kernel,
        out_shape=jax.ShapeDtypeStruct((T, B, O), query.dtype),
        grid_spec=pltpu.PrefetchScalarGridSpec(
            num_scalar_prefetch=0,
            grid=grid,
            in_specs=[
                pl.BlockSpec((T, Bb, Q), lambda i: (0, i, 0)),
                pl.BlockSpec((S, Bb, V), lambda i: (0, i, 0)),
                # Weights / biases: constant index_map -> resident in VMEM.
                pl.BlockSpec((V, Q), lambda i: (0, 0)),
                pl.BlockSpec((1, V), lambda i: (0, 0)),
                pl.BlockSpec((O, V + Q), lambda i: (0, 0)),
                pl.BlockSpec((1, O), lambda i: (0, 0)),
            ],
            out_specs=pl.BlockSpec((T, Bb, O), lambda i: (0, i, 0)),
        ),
        compiler_params=pltpu.CompilerParams(
            dimension_semantics=("parallel",)),
        cost_estimate=pl.CostEstimate(
            flops=flops, transcendentals=transcendentals,
            bytes_accessed=bytes_accessed),
    )(query, values, w1, b1_2d, w2, b2_2d)


def _reference(query, values, w1, b1, w2, b2):
    # Pure-JAX mirror of the PyTorch forward, for verification.
    qr = jnp.einsum("tbq,vq->tbv", query, w1) + b1              # linear1
    scores = jnp.einsum("btv,bsv->bts",
                        jnp.transpose(qr, (1, 0, 2)),
                        jnp.transpose(values, (1, 0, 2)))
    attn = jax.nn.softmax(scores, axis=-1)
    attended = jnp.einsum("bts,bsv->btv", attn,
                          jnp.transpose(values, (1, 0, 2)))
    attended = jnp.transpose(attended, (1, 0, 2))               # (T, B, V)
    feed = jnp.concatenate([attended, query], axis=-1)          # (T, B, V+Q)
    return jnp.tanh(jnp.einsum("tbf,of->tbo", feed, w2) + b2)


if __name__ == "__main__":
    # Small shapes: tgt_len T=8, src_len S=8, batch B=2,
    # query_size Q=32, values_size V=32, out_size O=32
    T, S, B = 8, 8, 2
    Q, V, O = 32, 32, 32

    key = jax.random.PRNGKey(0)
    kq, kv, kw1, kb1, kw2, kb2 = jax.random.split(key, 6)

    query = jax.random.normal(kq, (T, B, Q), dtype=jnp.float32)
    values = jax.random.normal(kv, (S, B, V), dtype=jnp.float32)

    # Deterministic parameter init (nn.Linear-style uniform bounds).
    bound1 = 1.0 / (Q ** 0.5)
    w1 = jax.random.uniform(kw1, (V, Q), minval=-bound1, maxval=bound1, dtype=jnp.float32)
    b1 = jax.random.uniform(kb1, (V,), minval=-bound1, maxval=bound1, dtype=jnp.float32)
    bound2 = 1.0 / ((Q + V) ** 0.5)
    w2 = jax.random.uniform(kw2, (O, V + Q), minval=-bound2, maxval=bound2, dtype=jnp.float32)
    b2 = jax.random.uniform(kb2, (O,), minval=-bound2, maxval=bound2, dtype=jnp.float32)

    out = jax.block_until_ready(global_attention(query, values, w1, b1, w2, b2))
    ref = _reference(query, values, w1, b1, w2, b2)

    assert out.shape == (T, B, O), out.shape
    max_err = float(jnp.max(jnp.abs(out - ref)))
    assert max_err < 2e-3, f"mismatch vs reference: max abs err {max_err}"

    print("KERNEL_OK")
</pallas_src>

<mosaic_0001>
module attributes {stable_mosaic.version = 11 : i64} {
  func.func @_global_attention_kernel(%arg0: i32, %arg1: memref<8x2x32xf32, #tpu.memory_space<vmem>>, %arg2: memref<8x2x32xf32, #tpu.memory_space<vmem>>, %arg3: memref<32x32xf32, #tpu.memory_space<vmem>>, %arg4: memref<1x32xf32, #tpu.memory_space<vmem>>, %arg5: memref<32x64xf32, #tpu.memory_space<vmem>>, %arg6: memref<1x32xf32, #tpu.memory_space<vmem>>, %arg7: memref<8x2x32xf32, #tpu.memory_space<vmem>>) attributes {dimension_semantics = [#tpu.dimension_semantics<parallel>], iteration_bounds = array<i64: 1>, scalar_prefetch = 0 : i64, scratch_operands = 0 : i64, tpu.core_type = #tpu.core_type<tc>, window_params = [{transform_indices = @transform_0, window_bounds = array<i64: 8, 2, 32>}, {transform_indices = @transform_1, window_bounds = array<i64: 8, 2, 32>}, {pipeline_mode = #tpu.pipeline_mode<synchronous>, transform_indices = @transform_2, window_bounds = array<i64: 32, 32>}, {pipeline_mode = #tpu.pipeline_mode<synchronous>, transform_indices = @transform_3, window_bounds = array<i64: 1, 32>}, {pipeline_mode = #tpu.pipeline_mode<synchronous>, transform_indices = @transform_4, window_bounds = array<i64: 32, 64>}, {pipeline_mode = #tpu.pipeline_mode<synchronous>, transform_indices = @transform_5, window_bounds = array<i64: 1, 32>}, {transform_indices = @transform_6, window_bounds = array<i64: 8, 2, 32>}]} {
    %c0 = arith.constant 0 : index
    %c0_0 = arith.constant 0 : index
    %0 = vector.load %arg3[%c0, %c0_0] : memref<32x32xf32, #tpu.memory_space<vmem>>, vector<32x32xf32>
    %c0_1 = arith.constant 0 : index
    %c0_2 = arith.constant 0 : index
    %1 = vector.load %arg4[%c0_1, %c0_2] : memref<1x32xf32, #tpu.memory_space<vmem>>, vector<1x32xf32>
    %c0_3 = arith.constant 0 : index
    %c0_4 = arith.constant 0 : index
    %2 = vector.load %arg5[%c0_3, %c0_4] : memref<32x64xf32, #tpu.memory_space<vmem>>, vector<32x64xf32>
    %c0_5 = arith.constant 0 : index
    %c0_6 = arith.constant 0 : index
    %3 = vector.load %arg6[%c0_5, %c0_6] : memref<1x32xf32, #tpu.memory_space<vmem>>, vector<1x32xf32>
    %c0_7 = arith.constant 0 : index
    %c0_8 = arith.constant 0 : index
    %c0_9 = arith.constant 0 : index
    %4 = vector.load %arg1[%c0_7, %c0_8, %c0_9] : memref<8x2x32xf32, #tpu.memory_space<vmem>>, vector<8x2x32xf32>
    %c0_10 = arith.constant 0 : index
    %c0_11 = arith.constant 0 : index
    %c0_12 = arith.constant 0 : index
    %5 = vector.load %arg2[%c0_10, %c0_11, %c0_12] : memref<8x2x32xf32, #tpu.memory_space<vmem>>, vector<8x2x32xf32>
    %6 = vector.extract_strided_slice %4 {offsets = [0, 0, 0], sizes = [8, 1, 32], strides = [1, 1, 1]} : vector<8x2x32xf32> to vector<8x1x32xf32>
    %7 = vector.shape_cast %6 : vector<8x1x32xf32> to vector<8x32xf32>
    %8 = vector.extract_strided_slice %5 {offsets = [0, 0, 0], sizes = [8, 1, 32], strides = [1, 1, 1]} : vector<8x2x32xf32> to vector<8x1x32xf32>
    %9 = vector.shape_cast %8 : vector<8x1x32xf32> to vector<8x32xf32>
    %cst = arith.constant dense<0.000000e+00> : vector<8x32xf32>
    %10 = tpu.matmul %7, %0, %cst {dimension_numbers = #tpu.dot_dimension_numbers<[1], [1], [0], [0], [0, 0, 1, 0], [], []>} : vector<8x32xf32>, vector<32x32xf32>, vector<8x32xf32> -> vector<8x32xf32>
    %11 = vector.broadcast %1 : vector<1x32xf32> to vector<8x32xf32>
    %12 = arith.addf %10, %11 : vector<8x32xf32>
    %cst_13 = arith.constant dense<0.000000e+00> : vector<8x8xf32>
    %13 = tpu.matmul %12, %9, %cst_13 {dimension_numbers = #tpu.dot_dimension_numbers<[1], [1], [0], [0], [0, 0, 1, 0], [], []>} : vector<8x32xf32>, vector<8x32xf32>, vector<8x8xf32> -> vector<8x8xf32>
    %cst_14 = arith.constant dense<0xFF800000> : vector<8xf32>
    %14 = vector.multi_reduction <maximumf>, %13, %cst_14 [1] : vector<8x8xf32> to vector<8xf32>
    %15 = vector.shape_cast %14 : vector<8xf32> to vector<8x1xf32>
    %16 = vector.broadcast %15 : vector<8x1xf32> to vector<8x8xf32>
    %17 = arith.subf %13, %16 : vector<8x8xf32>
    %18 = math.exp %17 : vector<8x8xf32>
    %cst_15 = arith.constant dense<0.000000e+00> : vector<8xf32>
    %19 = vector.multi_reduction <add>, %18, %cst_15 [1] : vector<8x8xf32> to vector<8xf32>
    %20 = vector.shape_cast %19 : vector<8xf32> to vector<8x1xf32>
    %21 = vector.broadcast %20 : vector<8x1xf32> to vector<8x8xf32>
    %22 = arith.divf %18, %21 : vector<8x8xf32>
    %cst_16 = arith.constant dense<0.000000e+00> : vector<8x32xf32>
    %23 = tpu.matmul %22, %9, %cst_16 {dimension_numbers = #tpu.dot_dimension_numbers<[1], [0], [0], [1], [0, 0, 1, 1], [], []>} : vector<8x8xf32>, vector<8x32xf32>, vector<8x32xf32> -> vector<8x32xf32>
    %24 = tpu.concatenate %23, %7 in 1 : vector<8x32xf32>, vector<8x32xf32> -> vector<8x64xf32>
    %cst_17 = arith.constant dense<0.000000e+00> : vector<8x32xf32>
    %25 = tpu.matmul %24, %2, %cst_17 {dimension_numbers = #tpu.dot_dimension_numbers<[1], [1], [0], [0], [0, 0, 1, 0], [], []>} : vector<8x64xf32>, vector<32x64xf32>, vector<8x32xf32> -> vector<8x32xf32>
    %26 = vector.broadcast %3 : vector<1x32xf32> to vector<8x32xf32>
    %27 = arith.addf %25, %26 : vector<8x32xf32>
    %28 = math.tanh %27 : vector<8x32xf32>
    %29 = vector.extract_strided_slice %4 {offsets = [0, 1, 0], sizes = [8, 1, 32], strides = [1, 1, 1]} : vector<8x2x32xf32> to vector<8x1x32xf32>
    %30 = vector.shape_cast %29 : vector<8x1x32xf32> to vector<8x32xf32>
    %31 = vector.extract_strided_slice %5 {offsets = [0, 1, 0], sizes = [8, 1, 32], strides = [1, 1, 1]} : vector<8x2x32xf32> to vector<8x1x32xf32>
    %32 = vector.shape_cast %31 : vector<8x1x32xf32> to vector<8x32xf32>
    %cst_18 = arith.constant dense<0.000000e+00> : vector<8x32xf32>
    %33 = tpu.matmul %30, %0, %cst_18 {dimension_numbers = #tpu.dot_dimension_numbers<[1], [1], [0], [0], [0, 0, 1, 0], [], []>} : vector<8x32xf32>, vector<32x32xf32>, vector<8x32xf32> -> vector<8x32xf32>
    %34 = vector.broadcast %1 : vector<1x32xf32> to vector<8x32xf32>
    %35 = arith.addf %33, %34 : vector<8x32xf32>
    %cst_19 = arith.constant dense<0.000000e+00> : vector<8x8xf32>
    %36 = tpu.matmul %35, %32, %cst_19 {dimension_numbers = #tpu.dot_dimension_numbers<[1], [1], [0], [0], [0, 0, 1, 0], [], []>} : vector<8x32xf32>, vector<8x32xf32>, vector<8x8xf32> -> vector<8x8xf32>
    %cst_20 = arith.constant dense<0xFF800000> : vector<8xf32>
    %37 = vector.multi_reduction <maximumf>, %36, %cst_20 [1] : vector<8x8xf32> to vector<8xf32>
    %38 = vector.shape_cast %37 : vector<8xf32> to vector<8x1xf32>
    %39 = vector.broadcast %38 : vector<8x1xf32> to vector<8x8xf32>
    %40 = arith.subf %36, %39 : vector<8x8xf32>
    %41 = math.exp %40 : vector<8x8xf32>
    %cst_21 = arith.constant dense<0.000000e+00> : vector<8xf32>
    %42 = vector.multi_reduction <add>, %41, %cst_21 [1] : vector<8x8xf32> to vector<8xf32>
    %43 = vector.shape_cast %42 : vector<8xf32> to vector<8x1xf32>
    %44 = vector.broadcast %43 : vector<8x1xf32> to vector<8x8xf32>
    %45 = arith.divf %41, %44 : vector<8x8xf32>
    %cst_22 = arith.constant dense<0.000000e+00> : vector<8x32xf32>
    %46 = tpu.matmul %45, %32, %cst_22 {dimension_numbers = #tpu.dot_dimension_numbers<[1], [0], [0], [1], [0, 0, 1, 1], [], []>} : vector<8x8xf32>, vector<8x32xf32>, vector<8x32xf32> -> vector<8x32xf32>
    %47 = tpu.concatenate %46, %30 in 1 : vector<8x32xf32>, vector<8x32xf32> -> vector<8x64xf32>
    %cst_23 = arith.constant dense<0.000000e+00> : vector<8x32xf32>
    %48 = tpu.matmul %47, %2, %cst_23 {dimension_numbers = #tpu.dot_dimension_numbers<[1], [1], [0], [0], [0, 0, 1, 0], [], []>} : vector<8x64xf32>, vector<32x64xf32>, vector<8x32xf32> -> vector<8x32xf32>
    %49 = vector.broadcast %3 : vector<1x32xf32> to vector<8x32xf32>
    %50 = arith.addf %48, %49 : vector<8x32xf32>
    %51 = math.tanh %50 : vector<8x32xf32>
    %52 = vector.shape_cast %28 : vector<8x32xf32> to vector<8x1x32xf32>
    %53 = vector.shape_cast %51 : vector<8x32xf32> to vector<8x1x32xf32>
    %54 = tpu.concatenate %52, %53 in 1 : vector<8x1x32xf32>, vector<8x1x32xf32> -> vector<8x2x32xf32>
    %c0_24 = arith.constant 0 : index
    %c0_25 = arith.constant 0 : index
    %c0_26 = arith.constant 0 : index
    %55 = vector.load %arg7[%c0_24, %c0_25, %c0_26] : memref<8x2x32xf32, #tpu.memory_space<vmem>>, vector<8x2x32xf32>
    tpu.vector_store %arg7[%c0_24, %c0_25, %c0_26], %54 {strides = array<i32>} : memref<8x2x32xf32, #tpu.memory_space<vmem>>, vector<8x2x32xf32>,
    return
  }
  func.func @transform_0(%arg0: i32) -> (i32, i32, i32) {
    %c0_i32 = arith.constant 0 : i32
    %c0_i32_0 = arith.constant 0 : i32
    %c0_i32_1 = arith.constant 0 : i32
    return %c0_i32, %arg0, %c0_i32_0 : i32, i32, i32
  }
  func.func @transform_1(%arg0: i32) -> (i32, i32, i32) {
    %c0_i32 = arith.constant 0 : i32
    %c0_i32_0 = arith.constant 0 : i32
    %c0_i32_1 = arith.constant 0 : i32
    return %c0_i32, %arg0, %c0_i32_0 : i32, i32, i32
  }
  func.func @transform_2(%arg0: i32) -> (i32, i32) {
    %c0_i32 = arith.constant 0 : i32
    %c0_i32_0 = arith.constant 0 : i32
    %c0_i32_1 = arith.constant 0 : i32
    return %c0_i32, %c0_i32_0 : i32, i32
  }
  func.func @transform_3(%arg0: i32) -> (i32, i32) {
    %c0_i32 = arith.constant 0 : i32
    %c0_i32_0 = arith.constant 0 : i32
    %c0_i32_1 = arith.constant 0 : i32
    return %c0_i32, %c0_i32_0 : i32, i32
  }
  func.func @transform_4(%arg0: i32) -> (i32, i32) {
    %c0_i32 = arith.constant 0 : i32
    %c0_i32_0 = arith.constant 0 : i32
    %c0_i32_1 = arith.constant 0 : i32
    return %c0_i32, %c0_i32_0 : i32, i32
  }
  func.func @transform_5(%arg0: i32) -> (i32, i32) {
    %c0_i32 = arith.constant 0 : i32
    %c0_i32_0 = arith.constant 0 : i32
    %c0_i32_1 = arith.constant 0 : i32
    return %c0_i32, %c0_i32_0 : i32, i32
  }
  func.func @transform_6(%arg0: i32) -> (i32, i32, i32) {
    %c0_i32 = arith.constant 0 : i32
    %c0_i32_0 = arith.constant 0 : i32
    %c0_i32_1 = arith.constant 0 : i32
    return %c0_i32, %arg0, %c0_i32_0 : i32, i32, i32
  }
}

</mosaic_0001>

<bundles_post_ra>
// kernel: global_attention.1
= control target key start
LH: loop header
LB: loop body
LE: loop exit
PB: predicated region body
PF: predicated region fallthrough
CT: control target
= control target key end

     0   :  { %11 = vsyncpa [#allocation3], 0  ;;  %s950_s0 = inlined_call_operand.hbm [shape: f32[8,2,32], index: 0, kind: input, shape index: {}]   ;;  %s951_s1 = inlined_call_operand.hbm [shape: f32[8,2,32], index: 1, kind: input, shape index: {}]   ;;  %s952_s2 = inlined_call_operand.hbm [shape: f32[32,32], index: 2, kind: input, shape index: {}]   ;;  %s953_s3 = inlined_call_operand.vmem [shape: f32[1,32], index: 3, kind: input, shape index: {}]   ;;  %s954_s4 = inlined_call_operand.hbm [shape: f32[32,64], index: 4, kind: input, shape index: {}]   ;;  %s955_s5 = inlined_call_operand.vmem [shape: f32[1,32], index: 5, kind: input, shape index: {}]   ;;  %s956_s6 = inlined_call_operand.hbm [shape: f32[8,2,32], index: 6, kind: output, shape index: {}]  }
   0x1   :  { %12 = vsyncpa [#allocation6], 0 }
   0x2   :  { %13 = vsyncpa [#allocation9], 0 }
   0x3   :  { %14 = vsyncpa [#allocation4], 0  ;;  %s32_s23 = sshll.u32 %s951_s1, 4  ;;  %s726_s24 = smov [#allocation5]   ;;  %s33_s23 = int_to_ptr.hbm [resolvable:$true] %s32_s23 }
   0x4   :  { %s34_s25 = sshll.u32 %s726_s24, 4  ;;  %s19_s28 = sshll.u32 %s950_s0, 4  ;;  %s35_s25 = int_to_ptr.vmem [resolvable:$true] %s34_s25  ;;  %s20_s28 = int_to_ptr.hbm [resolvable:$true] %s19_s28 }
   0x5   :  { %s727_s29 = smov 32   ;;  %s728_s30 = smov 2  }
   0x6   :  { %40 = dma.hbm_to_vmem [thread:$0]  %s33_s23, 256, %s35_s25, [#allocation6], %s727_s29, %s727_s29, %s728_s30  }
   0x7   :  { %s729_s7 = smov [#allocation2]   ;;  %s45_s1 = sshll.u32 %s952_s2, 4  ;;  %s46_s1 = int_to_ptr.hbm [resolvable:$true] %s45_s1 }
   0x8   :  { %s21_s8 = sshll.u32 %s729_s7, 4  ;;  %s730_s0 = smov [#allocation7]   ;;  %s22_s8 = int_to_ptr.vmem [resolvable:$true] %s21_s8 }
   0x9   :  { %27 = dma.hbm_to_vmem [thread:$0]  %s20_s28, 256, %s22_s8, [#allocation3], %s727_s29, %s727_s29, %s728_s30  }
   0xa   :  { %s47_s11 = sshll.u32 %s730_s0, 4  ;;  %s60_s14 = sshll.u32 %s954_s4, 4  ;;  %s48_s11 = int_to_ptr.vmem [resolvable:$true] %s47_s11  ;;  %s61_s14 = int_to_ptr.hbm [resolvable:$true] %s60_s14 }
   0xb   :  { %s731_s15 = smov 128   ;;  %s732_s16 = smov 8  }
   0xc   :  { %53 = dma.hbm_to_vmem [thread:$0]  %s46_s1, 512, %s48_s11, [#allocation6], %s731_s15, %s731_s15, %s732_s16  }
   0xd   :  { %s733_s17 = smov [#allocation8]  }
   0xe   :  { %s62_s18 = sshll.u32 %s733_s17, 4  ;;  %s63_s18 = int_to_ptr.vmem [resolvable:$true] %s62_s18 }
   0xf   :  { %68 = dma.hbm_to_vmem [thread:$0]  %s61_s14, 512, %s63_s18, [#allocation9], %s731_s15, %s731_s15, %s732_s16  }
  0x10   :  { %718 = dma.done.wait [#allocation3], 256  }
  0x11   :  { %719 = vsyncadd [#allocation3], 4294967040 }
  0x12   :  { %720 = dma.done.wait [#allocation6], 768  }
  0x13   :  { %721 = vsyncadd [#allocation6], 4294966528 }
  0x14   :  { %722 = dma.done.wait [#allocation9], 512  }
  0x15   :  { %723 = vsyncadd [#allocation9], 4294966784  ;;  %vm145_vm0 = vcmask 261120   ;;  %v788_v0 = vld [vmem:[#allocation7 + $0x18] sm:$0xff]  ;;  %v89_v1 = vld [vmem:[#allocation7 + $0x10] sm:$0xff]  ;;  %vm125_vm1 = vcmask 1041409  }
  0x16   :  { %549 = vmatpush.xpose.msk.msra.mxu0 %vm145_vm0, %v788_v0  ;;  %v792_v2 = vld [vmem:[#allocation2 + $0x2] sm:$0x3]  ;;  %v794_v3 = vld [vmem:[#allocation2 + $0x4] sm:$0x3]  ;;  %v796_v4 = vld [vmem:[#allocation2 + $0x6] sm:$0x3] }
  0x17   :  { %v798_v5 = vld [vmem:[#allocation2 + $0x8] sm:$0x3]  ;;  %v800_v6 = vld [vmem:[#allocation2] sm:$0x3]  ;;  %v802_v7 = vld [vmem:[#allocation2 + $0xa] sm:$0x3] }
  0x18   :  { %v804_v8 = vld [vmem:[#allocation2 + $0xc] sm:$0x3]  ;;  %v124_v9 = vrot.slane %v792_v2, 7  ;;  %v127_v10 = vrot.slane %v794_v3, 6  ;;  %vm128_vm2 = vcmask 1042434   ;;  %v130_v11 = vrot.slane %v796_v4, 5 }
  0x19   :  { %v810_v12 = vld [vmem:[#allocation2 + $0xe] sm:$0x3]  ;;  %vm131_vm3 = vcmask 1043459   ;;  %v133_v13 = vrot.slane %v798_v5, 4  ;;  %vm134_vm4 = vcmask 1044484   ;;  %v136_v16 = vrot.slane %v802_v7, 3 }
  0x1a   :  { %550 = vmatpush.xpose.msk.msra.mxu0 %vm145_vm0, %v89_v1  ;;  %v88_v14 = vld [vmem:[#allocation7 + $0x8] sm:$0xff]  ;;  %v126_v15 = vsel %vm125_vm1, %v124_v9, %v800_v6  ;;  %vm137_vm5 = vcmask 1045509   ;;  %v139_v18 = vrot.slane %v804_v8, 2  ;;  %vm140_vm6 = vcmask 1046534   ;;  %v87_v22 = vld [vmem:[#allocation7] sm:$0xff]  ;;  %s534_s23 = sshll.u32 %s956_s6, 4  ;;  %s535_s23 = int_to_ptr.hbm [resolvable:$true] %s534_s23 }
  0x1b   :  { %v129_v17 = vsel %vm128_vm2, %v127_v10, %v126_v15  ;;  %v142_v20 = vrot.slane %v810_v12, 1  ;;  %vm143_vm7 = vcmask 1047559   ;;  %v828_v26 = vld [vmem:[#allocation5 + $0x2] sm:$0x3]  ;;  %v830_v27 = vld [vmem:[#allocation5 + $0x4] sm:$0x3] }
  0x1c   :  { %v132_v19 = vsel %vm131_vm3, %v130_v11, %v129_v17  ;;  %v188_v28 = vrot.slane %v828_v26, 7  ;;  %v833_v29 = vld [vmem:[#allocation5] sm:$0x3]  ;;  %v835_v30 = vld [vmem:[#allocation5 + $0x6] sm:$0x3]  ;;  %v190_v31 = vrot.slane %v830_v27, 6 }
  0x1d   :  { %v135_v21 = vsel %vm134_vm4, %v133_v13, %v132_v19  ;;  %v838_v32 = vld [vmem:[#allocation5 + $0x8] sm:$0x3]  ;;  %v192_v34 = vrot.slane %v835_v30, 5  ;;  %v843_v35 = vld [vmem:[#allocation5 + $0xa] sm:$0x3]  ;;  %vm227_vm8 = vcmask 64512  }
  0x1e   :  { %551 = vmatpush.xpose.msk.msra.mxu0 %vm145_vm0, %v88_v14  ;;  %v138_v23 = vsel %vm137_vm5, %v136_v16, %v135_v21  ;;  %v189_v33 = vsel %vm125_vm1, %v188_v28, %v833_v29  ;;  %v194_v37 = vrot.slane %v838_v32, 4  ;;  %v847_v38 = vld [vmem:[#allocation5 + $0xc] sm:$0x3]  ;;  %v196_v40 = vrot.slane %v843_v35, 3  ;;  %v851_v41 = vld [vmem:[#allocation5 + $0xe] sm:$0x3] }
  0x1f   :  { %v141_v24 = vsel %vm140_vm6, %v139_v18, %v138_v23  ;;  %v191_v36 = vsel %vm128_vm2, %v190_v31, %v189_v33  ;;  %v198_v43 = vrot.slane %v847_v38, 2  ;;  %v200_v45 = vrot.slane %v851_v41, 1  ;;  %v868_v48 = vld [vmem:[%s953_s3] ss:$0 sm:$0xff]  ;;  %v95_v11 = vld [vmem:[#allocation8 + $0x18] sm:$0xff] }
  0x20   :  { %v144_v25 = vsel %vm143_vm7, %v142_v20, %v141_v24  ;;  %v193_v39 = vsel %vm131_vm3, %v192_v34, %v191_v36  ;;  %v320_v58 = vrot.slane %v800_v6, 1  ;;  %v322_v60 = vrot.slane %v794_v3, 7 }
  0x21   :  { %276 = vrot.lane.b32.xlu2 %v144_v25, %s727_s29  ;;  %v195_v42 = vsel %vm134_vm4, %v194_v37, %v193_v39  ;;  %v324_v61 = vrot.slane %v796_v4, 6  ;;  %v326_v62 = vrot.slane %v798_v5, 5  ;;  %v328_v63 = vrot.slane %v802_v7, 4  ;;  %v94_v5 = vld [vmem:[#allocation8 + $0x10] sm:$0xff] }
  0x22   :  { %552 = vmatpush.xpose.msk.msra.mxu0 %vm145_vm0, %v87_v22  ;;  %v197_v44 = vsel %vm137_vm5, %v196_v40, %v195_v42  ;;  %v321_v59 = vsel %vm125_vm1, %v792_v2, %v320_v58  ;;  %v332_v10 = vrot.slane %v810_v12, 2  ;;  %vm283_vm9 = vcmask 523264   ;;  %v92_v12 = vld [vmem:[#allocation8] sm:$0xff] }
  0x23   :  { %v199_v46 = vsel %vm140_vm6, %v198_v43, %v197_v44  ;;  %557 = vmatpush.xpose.msk.msra.mxu3 %vm283_vm9, %v95_v11  ;;  %v356_v24 = vrot.slane %v833_v29, 1  ;;  %v360_v31 = vrot.slane %v835_v30, 6  ;;  %v362_v34 = vrot.slane %v838_v32, 5 }
  0x24   :  { %v201_v47 = vsel %vm143_vm7, %v200_v45, %v199_v46  ;;  %v364_v36 = vrot.slane %v843_v35, 4  ;;  %v366_v37 = vrot.slane %v847_v38, 3  ;;  %v368_v40 = vrot.slane %v851_v41, 2 }
  0x25   :  { %553 = vmatmul.msk.f32.vlgmr.msra.gmra.mxu0 %vm145_vm0, %v144_v25  ;;  %554 = vmatpush.xpose.msk.msra.mxu1 %vm145_vm0, %v201_v47  ;;  %v358_v25 = vrot.slane %v830_v27, 7  ;;  %v357_v28 = vsel %vm125_vm1, %v828_v26, %v356_v24 }
  0x26   :  { %271 = vmatpush.msra.mxu2 %v201_v47  ;;  %570 = vmatpush.xpose.msk.msrb.mxu0 %vm283_vm9, %v95_v11 }
  0x27   :  { %558 = vmatpush.xpose.msk.msra.mxu3 %vm283_vm9, %v94_v5  ;;  %v359_v33 = vsel %vm128_vm2, %v358_v25, %v357_v28 }
  0x28   :  { %562 = vmatpush.xpose.msk.msrb.mxu2 %vm145_vm0, %v788_v0  ;;  %v323_v0 = vsel %vm128_vm2, %v322_v60, %v321_v59  ;;  %v361_v39 = vsel %vm131_vm3, %v360_v31, %v359_v33 }
  0x29   :  { %v325_v9 = vsel %vm131_vm3, %v324_v61, %v323_v0  ;;  %v363_v29 = vsel %vm134_vm4, %v362_v34, %v361_v39  ;;  %vm510_vm3 = vcmask 1040384  }
  0x2a   :  { %v327_v6 = vsel %vm134_vm4, %v326_v62, %v325_v9  ;;  %571 = vmatpush.xpose.msk.msrb.mxu0 %vm283_vm9, %v94_v5  ;;  %v365_v27 = vsel %vm137_vm5, %v364_v36, %v363_v29 }
  0x2b   :  { %v329_v2 = vsel %vm137_vm5, %v328_v63, %v327_v6  ;;  %v367_v26 = vsel %vm140_vm6, %v366_v37, %v365_v27 }
  0x2c   :  { %563 = vmatpush.xpose.msk.msrb.mxu2 %vm145_vm0, %v89_v1  ;;  %v330_v1 = vrot.slane %v804_v8, 3  ;;  %v93_v8 = vld [vmem:[#allocation8 + $0x8] sm:$0xff]  ;;  %v369_v30 = vsel %vm143_vm7, %v368_v40, %v367_v26 }
  0x2d   :  { %559 = vmatpush.xpose.msk.msra.mxu3 %vm283_vm9, %v93_v8  ;;  %567 = vmatpush.xpose.msk.msrb.mxu1 %vm145_vm0, %v369_v30 }
  0x2e   :  { %v331_v3 = vsel %vm140_vm6, %v330_v1, %v329_v2  ;;  %572 = vmatpush.xpose.msk.msrb.mxu0 %vm283_vm9, %v93_v8  ;;  %v585_v1 = vld [vmem:[%s955_s5] ss:$0 sm:$0xff]  ;;  %s734_s5 = smov [#allocation10]  }
  0x2f   :  { %v333_v4 = vsel %vm143_vm7, %v332_v10, %v331_v3  ;;  %s532_s20 = sshll.u32 %s734_s5, 4  ;;  %s533_s20 = int_to_ptr.vmem [resolvable:$true] %s532_s20 }
  0x30   :  { %564 = vmatpush.xpose.msk.msrb.mxu2 %vm145_vm0, %v88_v14  ;;  %443 = vrot.lane.b32.xlu2 %v333_v4, %s727_s29 }
  0x31   :  { %560 = vmatpush.xpose.msk.msra.mxu3 %vm283_vm9, %v92_v12 }
  0x32   :  { %573 = vmatpush.xpose.msk.msrb.mxu0 %vm283_vm9, %v92_v12 }
  0x34   :  { %565 = vmatpush.xpose.msk.msrb.mxu2 %vm145_vm0, %v87_v22 }
  0x7b   :  { %v277_v32 = vpop.permute.xlu2 %276 }
  0x8a   :  { %v444_v62 = vpop.permute.xlu2 %443 }
  0xa2   :  { %v177_v49 = vpop.f32.mrf.mxu0 }
  0xa3   :  { %v178_v50 = vadd.f32 %v868_v48, %v177_v49 }
  0xa5   :  { %555 = vmatmul.msk.f32.vlgmr.msra.gmra.mxu1 %vm145_vm0, %v178_v50 }
  0xa6   :  { %438 = vmatpush.msra.mxu1 %v369_v30 }
 0x122   :  { %v224_v51 = vpop.f32.mrf.mxu1 }
 0x123   :  { %v228_v52 = vsel %vm227_vm8, %v224_v51, -inf }
 0x124   :  { %229 = vmax.xlane.f32.xlu0 %v228_v52 }
 0x197   :  { %v230_v53 = vpop.xlane.xlu0 %229 }
 0x198   :  { %v231_v54 = vsub.f32 %v224_v51, %v230_v53 }
 0x19a   :  { %v232_v55 = vmul.f32 1.442695, %v231_v54 }
 0x19c   :  { %586 = vpow2.f32 %v232_v55 }
 0x1a2   :  { %v587_v56 = vpop.eup %586 }
 0x1a3   :  { %v234_v57 = vsel %vm227_vm8, %v587_v56, 0.0 }
 0x1a4   :  { %235 = vadd.xlane.f32.xlu0 %v234_v57 }
 0x217   :  { %v236_v7 = vpop.xlane.xlu0 %235 }
 0x218   :  { %588 = vrcp.f32 %v236_v7  ;;  %v248_v16 = vand.u32 2147483648, %v236_v7  ;;  %v246_v18 = vand.u32 2147483647, %v236_v7  ;;  %vm242_vm11 = vweird.f32 %v236_v7 }
 0x21a   :  { %v249_v20 = vor.u32 1.1754944e-38, %v248_v16  ;;  %vm247_vm13 = vcmp.eq.f32.partialorder %v246_v18, 8.507059e+37 }
 0x21e   :  { %v589_v13 = vpop.eup %588 }
 0x21f   :  { %v238_v14 = vmul.f32 %v589_v13, %v236_v7  ;;  %vm243_vm10 = vweird.f32 %v589_v13 }
 0x220   :  { %vm244_vm12 = vmor %vm242_vm11, %vm243_vm10 }
 0x221   :  { %v239_v15 = vsub.f32 1.0, %v238_v14 }
 0x223   :  { %v240_v17 = vmul.f32 %v589_v13, %v239_v15 }
 0x225   :  { %v241_v19 = vadd.f32 %v589_v13, %v240_v17 }
 0x227   :  { %v245_v21 = vsel %vm244_vm12, %v589_v13, %v241_v19 }
 0x228   :  { %v250_v22 = vsel %vm247_vm13, %v249_v20, %v245_v21 }
 0x229   :  { %v251_v23 = vmul.f32 %v587_v56, %v250_v22 }
 0x22b   :  { %556 = vmatmul.msk.f32.vlgmr.msra.gmra.mxu2 %vm227_vm8, %v251_v23 }
 0x233   :  { %566 = vmatmul.msk.f32.vlgmr.msrb.gmra.mxu2 %vm145_vm0, %v333_v4 }
 0x2ae   :  { %v273_v42 = vpop.f32.mrf.mxu2 }
 0x2af   :  { %v279_v35 = vsel %vm145_vm0, %v273_v42, %v277_v32 }
 0x2b0   :  { %561 = vmatmul.msk.f32.vlgmr.msra.gmra.mxu3 %vm283_vm9, %v279_v35 }
 0x2b6   :  { %v353_v38 = vpop.f32.mrf.mxu2 }
 0x2b7   :  { %v354_v41 = vadd.f32 %v868_v48, %v353_v38 }
 0x2b9   :  { %568 = vmatmul.msk.f32.vlgmr.msrb.gmra.mxu1 %vm145_vm0, %v354_v41 }
 0x333   :  { %v316_v9 = vpop.f32.mrf.mxu3 }
 0x334   :  { %v317_v10 = vadd.f32 %v585_v1, %v316_v9 }
 0x336   :  { %v392_v43 = vpop.f32.mrf.mxu1 }
 0x337   :  { %v395_v44 = vsel %vm227_vm8, %v392_v43, -inf }
 0x338   :  { %396 = vmax.xlane.f32.xlu1 %v395_v44 }
 0x3ab   :  { %v397_v45 = vpop.xlane.xlu1 %396 }
 0x3ac   :  { %v398_v46 = vsub.f32 %v392_v43, %v397_v45 }
 0x3ae   :  { %v399_v47 = vmul.f32 1.442695, %v398_v46 }
 0x3b0   :  { %590 = vpow2.f32 %v399_v47 }
 0x3b6   :  { %v591_v49 = vpop.eup %590 }
 0x3b7   :  { %v401_v50 = vsel %vm227_vm8, %v591_v49, 0.0 }
 0x3b8   :  { %402 = vadd.xlane.f32.xlu1 %v401_v50 }
 0x42b   :  { %v403_v51 = vpop.xlane.xlu1 %402 }
 0x42c   :  { %592 = vrcp.f32 %v403_v51  ;;  %v415_v48 = vand.u32 2147483648, %v403_v51  ;;  %v413_v56 = vand.u32 2147483647, %v403_v51  ;;  %vm409_vm15 = vweird.f32 %v403_v51 }
 0x42d   :  { %594 = vtanh.f32 %v317_v10 }
 0x42e   :  { %v416_v58 = vor.u32 1.1754944e-38, %v415_v48  ;;  %vm414_vm2 = vcmp.eq.f32.partialorder %v413_v56, 8.507059e+37 }
 0x432   :  { %v593_v52 = vpop.eup %592 }
 0x433   :  { %v405_v53 = vmul.f32 %v593_v52, %v403_v51  ;;  %vm410_vm14 = vweird.f32 %v593_v52  ;;  %v595_v3 = vpop.eup %594 }
 0x434   :  { %vm411_vm1 = vmor %vm409_vm15, %vm410_vm14  ;;  %v472_v4 = vrot.slane %v595_v3, 1  ;;  %v473_v11 = vrot.slane %v595_v3, 2  ;;  %v474_v7 = vrot.slane %v595_v3, 3  ;;  %v475_v8 = vrot.slane %v595_v3, 4 }
 0x435   :  { %v406_v54 = vsub.f32 1.0, %v405_v53  ;;  %v476_v24 = vrot.slane %v595_v3, 5  ;;  %v477_v39 = vrot.slane %v595_v3, 6  ;;  %v478_v29 = vrot.slane %v595_v3, 7 }
 0x437   :  { %v407_v55 = vmul.f32 %v593_v52, %v406_v54 }
 0x439   :  { %v408_v57 = vadd.f32 %v593_v52, %v407_v55 }
 0x43b   :  { %v412_v59 = vsel %vm411_vm1, %v593_v52, %v408_v57 }
 0x43c   :  { %v417_v60 = vsel %vm414_vm2, %v416_v58, %v412_v59 }
 0x43d   :  { %v418_v61 = vmul.f32 %v591_v49, %v417_v60 }
 0x43f   :  { %569 = vmatmul.msk.f32.vlgmr.msra.gmra.mxu1 %vm227_vm8, %v418_v61 }
 0x4bc   :  { %v440_v63 = vpop.f32.mrf.mxu1 }
 0x4bd   :  { %v446_v0 = vsel %vm145_vm0, %v440_v63, %v444_v62  ;;  %vm519_vm0 = vcmask 254976  }
 0x4be   :  { %574 = vmatmul.msk.f32.vlgmr.msrb.gmra.mxu0 %vm283_vm9, %v446_v0 }
 0x53b   :  { %v467_v6 = vpop.f32.mrf.mxu0 }
 0x53c   :  { %v468_v2 = vadd.f32 %v585_v1, %v467_v6 }
 0x53e   :  { %596 = vtanh.f32 %v468_v2 }
 0x544   :  { %v597_v5 = vpop.eup %596 }
 0x545   :  { %v487_v12 = vrot.slane %v597_v5, 1  ;;  %v488_v13 = vrot.slane %v597_v5, 2  ;;  %v489_v14 = vrot.slane %v597_v5, 3  ;;  %v490_v15 = vrot.slane %v597_v5, 4 }
 0x546   :  { %v491_v16 = vrot.slane %v597_v5, 5  ;;  %v492_v17 = vrot.slane %v597_v5, 6  ;;  %v493_v18 = vrot.slane %v597_v5, 7  ;;  %v494_v19 = vperm.slane %v597_v5, 0 }
 0x547   :  { %v495_v20 = vperm.slane %v487_v12, 0  ;;  %v496_v21 = vperm.slane %v488_v13, 0  ;;  %v497_v22 = vperm.slane %v489_v14, 0  ;;  %v498_v23 = vperm.slane %v490_v15, 0 }
 0x548   :  { %v499_v25 = vperm.slane %v491_v16, 0  ;;  %v500_v28 = vperm.slane %v492_v17, 0  ;;  %v511_v31 = vsel %vm510_vm3, %v595_v3, %v494_v19  ;;  %v501_v33 = vperm.slane %v493_v18, 0 }
 0x549   :  { %v512_v34 = vsel %vm510_vm3, %v472_v4, %v495_v20  ;;  %v513_v36 = vsel %vm510_vm3, %v473_v11, %v496_v21  ;;  %v514_v37 = vsel %vm510_vm3, %v474_v7, %v497_v22  ;;  %520 = vst.msk [vmem:[#allocation10] sm:$0x3] %vm519_vm0, %v511_v31  ;;  %v515_v40 = vsel %vm510_vm3, %v475_v8, %v498_v23 }
 0x54a   :  { %521 = vst.msk [vmem:[#allocation10 + $0x2] sm:$0x3] %vm519_vm0, %v512_v34  ;;  %v516_v27 = vsel %vm510_vm3, %v476_v24, %v499_v25  ;;  %v517_v26 = vsel %vm510_vm3, %v477_v39, %v500_v28  ;;  %v518_v30 = vsel %vm510_vm3, %v478_v29, %v501_v33 }
 0x54b   :  { %522 = vst.msk [vmem:[#allocation10 + $0x4] sm:$0x3] %vm519_vm0, %v513_v36 }
 0x54c   :  { %523 = vst.msk [vmem:[#allocation10 + $0x6] sm:$0x3] %vm519_vm0, %v514_v37 }
 0x54d   :  { %524 = vst.msk [vmem:[#allocation10 + $0x8] sm:$0x3] %vm519_vm0, %v515_v40 }
 0x54e   :  { %525 = vst.msk [vmem:[#allocation10 + $0xa] sm:$0x3] %vm519_vm0, %v516_v27 }
 0x54f   :  { %526 = vst.msk [vmem:[#allocation10 + $0xc] sm:$0x3] %vm519_vm0, %v517_v26 }
 0x550   :  { %527 = vst.msk [vmem:[#allocation10 + $0xe] sm:$0x3] %vm519_vm0, %v518_v30 }
 0x551   :  { %540 = dma.vmem_to_hbm [thread:$0]  %s533_s20, 256, %s535_s23, [#allocation4], %s727_s29, %s727_s29, %s728_s30  }
 0x552   :  { %724 = dma.done.wait [#allocation4], 256  }
 0x553   :  { %725 = vsyncadd [#allocation4], 4294967040 }
 0x554   :  { %545 = vsyncpa [#allocation3], 1 }
 0x555   :  { %546 = vsyncpa [#allocation6], 1 }
 0x556   :  { %547 = vsyncpa [#allocation9], 1 }
 0x557   :  { %548 = vsyncpa [#allocation4], 1 }

</bundles_post_ra>
